<compile_context>
chip_gen: v7x
topology: tpu7x:2x2x1
jax: 0.10.0
libtpu: 0.0.40
codegen_flags: <defaults>
</compile_context>

<pallas_src>
import jax
import jax.numpy as jnp
from jax import lax
from jax.experimental import pallas as pl
from jax.experimental.pallas import tpu as pltpu

NUM_FEATURES = 27
H1 = 128
H2 = 256
NEG_SLOPE = 0.2


def _leaky_relu(x, slope=NEG_SLOPE):
    # Exact for slope in [0, 1]; 2 VALU ops (mul + max) instead of cmp+select+mul.
    return jnp.maximum(x, slope * x)


def _round_up(n, m):
    return ((n + m - 1) // m) * m


def discriminator_kernel(x_ref, w1_ref, b1_ref, w2_ref, b2_ref, w3t_ref, b3_ref, o_ref):
    """One batch tile of the fused MLP.

    x_ref  : (TILE_B, 27)  f32 input tile (pipelined)
    w*_ref : bf16 weights (resident in VMEM across all grid steps)
    b*_ref : f32 biases
    o_ref  : (1, TILE_B)   f32 lane-dense output row (batch on lanes)
    """
    # f32 -> bf16 cast inside the kernel (cheap VPU op hidden under the MXU).
    x = x_ref[...].astype(jnp.bfloat16)

    # Layer 1: (TILE_B, 27) @ (27, 128), f32 accumulation.
    h1 = jnp.dot(x, w1_ref[...], preferred_element_type=jnp.float32) + b1_ref[...]
    h1 = _leaky_relu(h1)
    # Dropout(0.3): identity in eval mode.

    # Layer 2: (TILE_B, 128) @ (128, 256), f32 accumulation.
    h2 = jnp.dot(h1.astype(jnp.bfloat16), w2_ref[...],
                 preferred_element_type=jnp.float32) + b2_ref[...]
    h2 = _leaky_relu(h2)
    # Dropout(0.3): identity in eval mode.

    # Layer 3: contract w3^T (1, 256) against h2's 256-axis so the result lands
    # lane-major as (1, TILE_B) -- lane-dense store, batch on lanes.
    logit_t = lax.dot_general(
        w3t_ref[...], h2.astype(jnp.bfloat16),
        dimension_numbers=(((1,), (1,)), ((), ())),
        preferred_element_type=jnp.float32,
    ) + b3_ref[...]

    # Sigmoid: exp and approx reciprocal both issue on the (otherwise idle) EUP slot.
    o_ref[...] = pl.reciprocal(1.0 + jnp.exp(-logit_t), approx=True).astype(o_ref.dtype)


def _choose_tile(batch, tile_b):
    """Multiple-of-128 batch tile; keep >=2 grid steps when the batch allows it
    so the 'parallel' axis shards across both TensorCores on v7x."""
    tile_b = max(128, (tile_b // 128) * 128)
    if batch <= 128:
        return 128
    half = _round_up(pl.cdiv(batch, 2), 128)
    return min(tile_b, half)


def discriminator_forward(x, kernel_params, *, tile_b=2048):
    """x: (B, NUM_FEATURES) float32. Returns (B, 1) float32 (eval-mode forward).

    `kernel_params` must come from prepare_params() (bf16 weights, f32 biases).
    """
    w1_bf, b1, w2_bf, b2, w3t_bf, b3 = kernel_params
    B = x.shape[0]

    tile_b = _choose_tile(B, tile_b)
    grid_b = pl.cdiv(B, tile_b)
    b_pad = grid_b * tile_b  # output array is padded; input x is NOT padded.

    # Advisory cost hint for XLA's scheduler around the custom call.
    flops = 2 * b_pad * (NUM_FEATURES * H1 + H1 * H2 + H2)
    bytes_accessed = (
        B * NUM_FEATURES * 4            # x read (f32)
        + b_pad * 4                      # output write (f32)
        + (NUM_FEATURES * H1 + H1 * H2 + H2) * 2   # bf16 weights
        + (H1 + H2 + 1) * 4              # f32 biases
    )
    cost = pl.CostEstimate(flops=flops, transcendentals=2 * b_pad,
                           bytes_accessed=bytes_accessed)

    out_t = pl.pallas_call(
        discriminator_kernel,
        out_shape=jax.ShapeDtypeStruct((1, b_pad), jnp.float32),
        grid=(grid_b,),
        in_specs=[
            pl.BlockSpec((tile_b, NUM_FEATURES), lambda i: (i, 0)),  # x tile (pipelined)
            pl.BlockSpec((NUM_FEATURES, H1), lambda i: (0, 0)),      # w1 (resident)
            pl.BlockSpec((1, H1), lambda i: (0, 0)),                 # b1
            pl.BlockSpec((H1, H2), lambda i: (0, 0)),                # w2
            pl.BlockSpec((1, H2), lambda i: (0, 0)),                 # b2
            pl.BlockSpec((1, H2), lambda i: (0, 0)),                 # w3^T
            pl.BlockSpec((1, 1), lambda i: (0, 0)),                  # b3
        ],
        out_specs=pl.BlockSpec((1, tile_b), lambda i: (0, i)),       # lane-dense output
        compiler_params=pltpu.CompilerParams(
            # Independent batch tiles: shard across TCs on v7x, pipeline everywhere.
            # ~6 MiB live VMEM at tile_b=2048 -> under the default scoped limit on
            # every generation (incl. v5e's 16 MiB), so no vmem_limit_bytes needed.
            dimension_semantics=("parallel",),
        ),
        cost_estimate=cost,
    )(x, w1_bf, b1, w2_bf, b2, w3t_bf, b3)

    # (1, b_pad) lane-dense row -> (B, 1) column (layout plumbing only).
    return out_t.reshape(b_pad, 1)[:B]


def init_params(key):
    """Deterministic init mirroring nn.Linear's U(-1/sqrt(fan_in), 1/sqrt(fan_in))."""
    k1, k2, k3, k4, k5, k6 = jax.random.split(key, 6)

    def lin(kw, kb, fan_in, fan_out):
        bound = 1.0 / jnp.sqrt(jnp.float32(fan_in))
        w = jax.random.uniform(kw, (fan_in, fan_out), jnp.float32, -bound, bound)
        b = jax.random.uniform(kb, (1, fan_out), jnp.float32, -bound, bound)
        return w, b

    w1, b1 = lin(k1, k2, NUM_FEATURES, H1)
    w2, b2 = lin(k3, k4, H1, H2)
    w3, b3 = lin(k5, k6, H2, 1)
    return (w1, b1, w2, b2, w3, b3)


def prepare_params(params):
    """One-time pre-cast of weights to bf16 (native MXU dtype) and w3 -> w3^T."""
    w1, b1, w2, b2, w3, b3 = params
    return (
        w1.astype(jnp.bfloat16),
        b1,
        w2.astype(jnp.bfloat16),
        b2,
        w3.reshape(1, H2).astype(jnp.bfloat16),
        b3,
    )


def reference_forward(x, params):
    """Plain-JAX reference using the same bf16-rounded operands as the kernel."""
    w1, b1, w2, b2, w3, b3 = params
    bf = lambda a: a.astype(jnp.bfloat16).astype(jnp.float32)
    h1 = _leaky_relu(bf(x) @ bf(w1) + b1)
    h2 = _leaky_relu(bf(h1) @ bf(w2) + b2)
    return jax.nn.sigmoid(bf(h2) @ bf(w3) + b3)


if __name__ == "__main__":
    key = jax.random.PRNGKey(0)
    k_params, k_data = jax.random.split(key)

    params = init_params(k_params)
    kernel_params = prepare_params(params)

    batch = 8
    patient_data = jax.random.normal(k_data, (batch, NUM_FEATURES), jnp.float32)

    out = discriminator_forward(patient_data, kernel_params)
    out = jax.block_until_ready(out)

    ref = reference_forward(patient_data, params)
    assert out.shape == (batch, 1), out.shape
    assert jnp.allclose(out, ref, atol=1e-2, rtol=1e-2), (
        f"max err {jnp.max(jnp.abs(out - ref))}"
    )

    print("KERNEL_OK")
</pallas_src>

<mosaic_0001>
module attributes {stable_mosaic.version = 11 : i64} {
  func.func @discriminator_kernel(%arg0: i32, %arg1: memref<128x27xf32, #tpu.memory_space<vmem>>, %arg2: memref<27x128xbf16, #tpu.memory_space<vmem>>, %arg3: memref<1x128xf32, #tpu.memory_space<vmem>>, %arg4: memref<128x256xbf16, #tpu.memory_space<vmem>>, %arg5: memref<1x256xf32, #tpu.memory_space<vmem>>, %arg6: memref<1x256xbf16, #tpu.memory_space<vmem>>, %arg7: memref<1x1xf32, #tpu.memory_space<vmem>>, %arg8: memref<1x128xf32, #tpu.memory_space<vmem>>) attributes {dimension_semantics = [#tpu.dimension_semantics<parallel>], iteration_bounds = array<i64: 1>, scalar_prefetch = 0 : i64, scratch_operands = 0 : i64, tpu.core_type = #tpu.core_type<tc>, window_params = [{transform_indices = @transform_0, window_bounds = array<i64: 128, 27>}, {pipeline_mode = #tpu.pipeline_mode<synchronous>, transform_indices = @transform_1, window_bounds = array<i64: 27, 128>}, {pipeline_mode = #tpu.pipeline_mode<synchronous>, transform_indices = @transform_2, window_bounds = array<i64: 1, 128>}, {pipeline_mode = #tpu.pipeline_mode<synchronous>, transform_indices = @transform_3, window_bounds = array<i64: 128, 256>}, {pipeline_mode = #tpu.pipeline_mode<synchronous>, transform_indices = @transform_4, window_bounds = array<i64: 1, 256>}, {pipeline_mode = #tpu.pipeline_mode<synchronous>, transform_indices = @transform_5, window_bounds = array<i64: 1, 256>}, {pipeline_mode = #tpu.pipeline_mode<synchronous>, transform_indices = @transform_6, window_bounds = array<i64: 1, 1>}, {transform_indices = @transform_7, window_bounds = array<i64: 1, 128>}]} {
    %c0 = arith.constant 0 : index
    %c0_0 = arith.constant 0 : index
    %0 = vector.load %arg1[%c0, %c0_0] : memref<128x27xf32, #tpu.memory_space<vmem>>, vector<128x27xf32>
    %1 = arith.truncf %0 : vector<128x27xf32> to vector<128x27xbf16>
    %c0_1 = arith.constant 0 : index
    %c0_2 = arith.constant 0 : index
    %2 = vector.load %arg2[%c0_1, %c0_2] : memref<27x128xbf16, #tpu.memory_space<vmem>>, vector<27x128xbf16>
    %cst = arith.constant dense<0.000000e+00> : vector<128x128xf32>
    %3 = tpu.matmul %1, %2, %cst {dimension_numbers = #tpu.dot_dimension_numbers<[1], [0], [0], [1], [0, 0, 1, 1], [], []>} : vector<128x27xbf16>, vector<27x128xbf16>, vector<128x128xf32> -> vector<128x128xf32>
    %c0_3 = arith.constant 0 : index
    %c0_4 = arith.constant 0 : index
    %4 = vector.load %arg3[%c0_3, %c0_4] : memref<1x128xf32, #tpu.memory_space<vmem>>, vector<1x128xf32>
    %5 = vector.broadcast %4 : vector<1x128xf32> to vector<128x128xf32>
    %6 = arith.addf %3, %5 : vector<128x128xf32>
    %cst_5 = arith.constant 2.000000e-01 : f32
    %7 = vector.broadcast %cst_5 : f32 to vector<128x128xf32>
    %8 = arith.mulf %7, %6 : vector<128x128xf32>
    %9 = arith.maximumf %6, %8 : vector<128x128xf32>
    %10 = arith.truncf %9 : vector<128x128xf32> to vector<128x128xbf16>
    %c0_6 = arith.constant 0 : index
    %c0_7 = arith.constant 0 : index
    %11 = vector.load %arg4[%c0_6, %c0_7] : memref<128x256xbf16, #tpu.memory_space<vmem>>, vector<128x256xbf16>
    %cst_8 = arith.constant dense<0.000000e+00> : vector<128x256xf32>
    %12 = tpu.matmul %10, %11, %cst_8 {dimension_numbers = #tpu.dot_dimension_numbers<[1], [0], [0], [1], [0, 0, 1, 1], [], []>} : vector<128x128xbf16>, vector<128x256xbf16>, vector<128x256xf32> -> vector<128x256xf32>
    %c0_9 = arith.constant 0 : index
    %c0_10 = arith.constant 0 : index
    %13 = vector.load %arg5[%c0_9, %c0_10] : memref<1x256xf32, #tpu.memory_space<vmem>>, vector<1x256xf32>
    %14 = vector.broadcast %13 : vector<1x256xf32> to vector<128x256xf32>
    %15 = arith.addf %12, %14 : vector<128x256xf32>
    %cst_11 = arith.constant 2.000000e-01 : f32
    %16 = vector.broadcast %cst_11 : f32 to vector<128x256xf32>
    %17 = arith.mulf %16, %15 : vector<128x256xf32>
    %18 = arith.maximumf %15, %17 : vector<128x256xf32>
    %c0_12 = arith.constant 0 : index
    %c0_13 = arith.constant 0 : index
    %19 = vector.load %arg6[%c0_12, %c0_13] : memref<1x256xbf16, #tpu.memory_space<vmem>>, vector<1x256xbf16>
    %20 = arith.truncf %18 : vector<128x256xf32> to vector<128x256xbf16>
    %cst_14 = arith.constant dense<0.000000e+00> : vector<1x128xf32>
    %21 = tpu.matmul %19, %20, %cst_14 {dimension_numbers = #tpu.dot_dimension_numbers<[1], [1], [0], [0], [0, 0, 1, 0], [], []>} : vector<1x256xbf16>, vector<128x256xbf16>, vector<1x128xf32> -> vector<1x128xf32>
    %c0_15 = arith.constant 0 : index
    %c0_16 = arith.constant 0 : index
    %22 = vector.load %arg7[%c0_15, %c0_16] : memref<1x1xf32, #tpu.memory_space<vmem>>, vector<1x1xf32>
    %23 = vector.broadcast %22 : vector<1x1xf32> to vector<1x128xf32>
    %24 = arith.addf %21, %23 : vector<1x128xf32>
    %cst_17 = arith.constant 0.000000e+00 : f32
    %25 = vector.broadcast %cst_17 : f32 to vector<1x128xf32>
    %26 = arith.subf %25, %24 : vector<1x128xf32>
    %27 = math.exp %26 : vector<1x128xf32>
    %cst_18 = arith.constant 1.000000e+00 : f32
    %28 = vector.broadcast %cst_18 : f32 to vector<1x128xf32>
    %29 = arith.addf %28, %27 : vector<1x128xf32>
    %30 = tpu.reciprocal %29 {approx = true} : vector<1x128xf32> -> vector<1x128xf32>
    %c0_19 = arith.constant 0 : index
    %c0_20 = arith.constant 0 : index
    %31 = vector.load %arg8[%c0_19, %c0_20] : memref<1x128xf32, #tpu.memory_space<vmem>>, vector<1x128xf32>
    tpu.vector_store %arg8[%c0_19, %c0_20], %30 {strides = array<i32>} : memref<1x128xf32, #tpu.memory_space<vmem>>, vector<1x128xf32>,
    return
  }
  func.func @transform_0(%arg0: i32) -> (i32, i32) {
    %c0_i32 = arith.constant 0 : i32
    %c0_i32_0 = arith.constant 0 : i32
    return %arg0, %c0_i32 : i32, i32
  }
  func.func @transform_1(%arg0: i32) -> (i32, i32) {
    %c0_i32 = arith.constant 0 : i32
    %c0_i32_0 = arith.constant 0 : i32
    %c0_i32_1 = arith.constant 0 : i32
    return %c0_i32, %c0_i32_0 : i32, i32
  }
  func.func @transform_2(%arg0: i32) -> (i32, i32) {
    %c0_i32 = arith.constant 0 : i32
    %c0_i32_0 = arith.constant 0 : i32
    %c0_i32_1 = arith.constant 0 : i32
    return %c0_i32, %c0_i32_0 : i32, i32
  }
  func.func @transform_3(%arg0: i32) -> (i32, i32) {
    %c0_i32 = arith.constant 0 : i32
    %c0_i32_0 = arith.constant 0 : i32
    %c0_i32_1 = arith.constant 0 : i32
    return %c0_i32, %c0_i32_0 : i32, i32
  }
  func.func @transform_4(%arg0: i32) -> (i32, i32) {
    %c0_i32 = arith.constant 0 : i32
    %c0_i32_0 = arith.constant 0 : i32
    %c0_i32_1 = arith.constant 0 : i32
    return %c0_i32, %c0_i32_0 : i32, i32
  }
  func.func @transform_5(%arg0: i32) -> (i32, i32) {
    %c0_i32 = arith.constant 0 : i32
    %c0_i32_0 = arith.constant 0 : i32
    %c0_i32_1 = arith.constant 0 : i32
    return %c0_i32, %c0_i32_0 : i32, i32
  }
  func.func @transform_6(%arg0: i32) -> (i32, i32) {
    %c0_i32 = arith.constant 0 : i32
    %c0_i32_0 = arith.constant 0 : i32
    %c0_i32_1 = arith.constant 0 : i32
    return %c0_i32, %c0_i32_0 : i32, i32
  }
  func.func @transform_7(%arg0: i32) -> (i32, i32) {
    %c0_i32 = arith.constant 0 : i32
    %c0_i32_0 = arith.constant 0 : i32
    return %c0_i32, %arg0 : i32, i32
  }
}

</mosaic_0001>

<bundles_post_ra>
// kernel: tpu_custom_call.1
= control target key start
LH: loop header
LB: loop body
LE: loop exit
PB: predicated region body
PF: predicated region fallthrough
CT: control target
= control target key end

     0   :  { %s1082_s0 = inlined_call_operand.hbm [shape: f32[8,27], index: 0, kind: input, shape index: {}]   ;;  %s1083_s1 = inlined_call_operand.hbm [shape: bf16[27,128], index: 1, kind: input, shape index: {}]   ;;  %s1084_s2 = inlined_call_operand.vmem [shape: f32[1,128], index: 2, kind: input, shape index: {}]   ;;  %s1085_s3 = inlined_call_operand.hbm [shape: bf16[128,256], index: 3, kind: input, shape index: {}]   ;;  %s1086_s4 = inlined_call_operand.vmem [shape: f32[1,256], index: 4, kind: input, shape index: {}]   ;;  %s1087_s5 = inlined_call_operand.vmem [shape: bf16[1,256], index: 5, kind: input, shape index: {}]   ;;  %s1088_s6 = inlined_call_operand.<no memory space> [shape: f32[1,1], index: 6, kind: input, shape index: {}]   ;;  %s1089_s7 = inlined_call_operand.hbm [shape: f32[1,128], index: 7, kind: output, shape index: {}]  }
   0x1   :  { %v12_v0 = vstv %s1088_s6 }
   0x2   :  { %13 = vst [vmem:[#allocation2] sm:$0x1] %v12_v0 }
   0x3   :  { %14 = vsyncpa [#allocation4], 0 }
   0x4   :  { %15 = vsyncpa [#allocation7], 0 }
   0x5   :  { %16 = vsyncpa [#allocation5], 0 }
   0x6   :  { %21 = vsyncadd [#allocation4], 1920  ;;  %s879_s26 = smov [#allocation6]   ;;  %s785_s30 = scalar_lea.hbm %s1083_s1, 256 }
   0x7   :  { %s34_s27 = sshll.u32 %s879_s26, 4  ;;  %p786_p0 = scmp.ne.s32.totalorder %s1083_s1, %s785_s30  ;;  %s35_s27 = int_to_ptr.vmem [resolvable:$true] %s34_s27 }
   0x8   :  { %p789_p1 = scmp.lt.u32.totalorder %s785_s30, %s1083_s1 }
   0xa   :  { %p791_p2 = pnand %p789_p1, %p786_p0 }
   0xc   :  { %794 = shalt.err (!%p791_p2)
}
   0xd   :  { %s795_s6 = scalar_lea.vmem %s35_s27, 256  ;;  %p800_p4 = scmp.lt.s32.totalorder %s35_s27, %s35_s27 }
   0xe   :  { %p796_p3 = scmp.ne.s32.totalorder %s35_s27, %s795_s6  ;;  %p801_p5 = scmp.lt.s32.totalorder %s795_s6, %s795_s6 }
  0x10   :  { %p802_p6 = por %p801_p5, %p800_p4 }
  0x12   :  { %p803_p7 = pnand %p802_p6, %p796_p3 }
  0x14   :  { %806 = shalt.err (!%p803_p7)
}
  0x15   :  { %s880_s12 = smov 64   ;;  %s881_s13 = smov 4  }
  0x16   :  { %40 = dma.hbm_to_vmem [thread:$0]  %s1083_s1, 256, %s35_s27, [#allocation7], %s880_s12, %s880_s12, %s881_s13  }
  0x17   :  { %s882_s16 = smov [#allocation3]   ;;  %s807_s20 = scalar_lea.hbm %s1082_s0, 128 }
  0x18   :  { %s22_s17 = sshll.u32 %s882_s16, 4  ;;  %p808_p8 = scmp.ne.s32.totalorder %s1082_s0, %s807_s20  ;;  %s23_s17 = int_to_ptr.vmem [resolvable:$true] %s22_s17 }
  0x19   :  { %p811_p9 = scmp.lt.u32.totalorder %s807_s20, %s1082_s0 }
  0x1b   :  { %p813_p10 = pnand %p811_p9, %p808_p8 }
  0x1d   :  { %816 = shalt.err (!%p813_p10)
}
  0x1e   :  { %s817_s25 = scalar_lea.vmem %s23_s17, 128  ;;  %s821_s1 = scalar_lea.vmem %s23_s17, 2048 }
  0x1f   :  { %p818_p11 = scmp.ne.s32.totalorder %s23_s17, %s817_s25  ;;  %p822_p12 = scmp.lt.s32.totalorder %s23_s17, %s23_s17 }
  0x20   :  { %p823_p13 = scmp.lt.s32.totalorder %s821_s1, %s817_s25 }
  0x22   :  { %p824_p0 = por %p823_p13, %p822_p12 }
  0x24   :  { %p825_p1 = pnand %p824_p0, %p818_p11 }
  0x26   :  { %828 = shalt.err (!%p825_p1)
}
  0x27   :  { %s883_s26 = smov 128   ;;  %s884_s27 = smov 8  }
  0x28   :  { %28 = dma.hbm_to_vmem [thread:$0]  %s1082_s0, 128, %s23_s17, [#allocation4], %s883_s26, %s883_s26, %s884_s27  }
  0x29   :  { %s885_s30 = smov [#allocation8]   ;;  %s829_s11 = scalar_lea.hbm %s1085_s3, 2048 }
  0x2a   :  { %s48_s8 = sshll.u32 %s885_s30, 4  ;;  %p830_p2 = scmp.ne.s32.totalorder %s1085_s3, %s829_s11  ;;  %s49_s8 = int_to_ptr.vmem [resolvable:$true] %s48_s8 }
  0x2b   :  { %p833_p3 = scmp.lt.u32.totalorder %s829_s11, %s1085_s3 }
  0x2d   :  { %p835_p4 = pnand %p833_p3, %p830_p2 }
  0x2f   :  { %838 = shalt.err (!%p835_p4)
}
  0x30   :  { %s839_s15 = scalar_lea.vmem %s49_s8, 2048  ;;  %p844_p6 = scmp.lt.s32.totalorder %s49_s8, %s49_s8 }
  0x31   :  { %p840_p5 = scmp.ne.s32.totalorder %s49_s8, %s839_s15  ;;  %p845_p7 = scmp.lt.s32.totalorder %s839_s15, %s839_s15 }
  0x33   :  { %p846_p8 = por %p845_p7, %p844_p6 }
  0x35   :  { %p847_p9 = pnand %p846_p8, %p840_p5 }
  0x37   :  { %850 = shalt.err (!%p847_p9)
}
  0x38   :  { %54 = dma.hbm_to_vmem [thread:$0]  %s1085_s3, 2048, %s49_s8, [#allocation7], %s883_s26, %s883_s26, %s884_s27  }
  0x39   :  { %873 = dma.done.wait [#allocation4], 2048  }
  0x3a   :  { %874 = vsyncadd [#allocation4], 4294965248 }
  0x3b   :  { %875 = dma.done.wait [#allocation7], 2304  }
  0x3c   :  { %876 = vsyncadd [#allocation7], 4294964992  ;;  %vm142_vm0 = vcmask 1044480   ;;  %vm143_vm1 = vcmask 1045504   ;;  %v886_v1 = vmov 65535   ;;  %v755_v3 = vld [vmem:[#allocation6] sm:$0xff]  }
  0x3d   :  { %v144_v2 = vsel %vm142_vm0, 4294967295, %v886_v1  ;;  %v756_v5 = vld [vmem:[#allocation6 + $0x8] sm:$0x3f]   ;;  %723 = vmatprep.subr.bf16.mxu0 %v755_v3  ;;  %v71_v6 = vld [vmem:[#allocation3] sm:$0xff]  ;;  %vm117_vm2 = vcmask 220160   ;;  %v73_v10 = vld [vmem:[#allocation3 + $0x10] sm:$0xff] }
  0x3e   :  { %v145_v4 = vsel %vm143_vm1, %v144_v2, 0  ;;  %v72_v7 = vld [vmem:[#allocation3 + $0x8] sm:$0xff]  ;;  %724 = vmatpush3.bf16.msra.mxu0 %v755_v3  ;;  %v74_v11 = vld [vmem:[#allocation3 + $0x18] sm:$0xff]  ;;  %v75_v12 = vld [vmem:[#allocation3 + $0x20] sm:$0xff]  ;;  %v887_v47 = vmov 0  }
  0x3f   :  { %v147_v8 = vand.u32 %v756_v5, %v145_v4  ;;  %v87_v9 = vpack.c.bf16 %v72_v7, %v71_v6  ;;  %v76_v13 = vld [vmem:[#allocation3 + $0x28] sm:$0xff]  ;;  %v88_v14 = vpack.c.bf16 %v74_v11, %v73_v10  ;;  %v757_v16 = vld [vmem:[#allocation8 + $0x4] ss:$8 sps:$4 sm:$0xff]   ;;  %v759_v17 = vld [vmem:[#allocation8] ss:$8 sps:$4 sm:$0xff]   ;;  %426 = vmatprep.mubr.bf16.mxu1 %v887_v47  ;;  %754 = vset.pattern.permute.xlu0 %v887_v47 }
  0x40   :  { %v89_v15 = vpack.c.bf16 %v76_v13, %v75_v12  ;;  %v77_v18 = vld [vmem:[#allocation3 + $0x30] sm:$0xff]  ;;  %v78_v19 = vld [vmem:[#allocation3 + $0x38] sm:$0xff]  ;;  %v760_v20 = vld [vmem:[#allocation8 + $0x14] ss:$8 sps:$4 sm:$0xff]   ;;  %394 = vmatprep.subr.bf16.mxu1 %v757_v16 }
  0x41   :  { %725 = vmatprep.subr.bf16.mxu0 %v147_v8  ;;  %727 = vmatprep.mubr.msk.bf16.mxu0 %vm117_vm2, %v87_v9  ;;  %v79_v21 = vld [vmem:[#allocation3 + $0x40] sm:$0xff]  ;;  %v80_v23 = vld [vmem:[#allocation3 + $0x48] sm:$0xff]  ;;  %v763_v24 = vld [vmem:[#allocation8 + $0x24] ss:$8 sps:$4 sm:$0xff]   ;;  %v90_v26 = vpack.c.bf16 %v78_v19, %v77_v18 }
  0x42   :  { %726 = vmatpush3.bf16.msra.mxu0 %v147_v8  ;;  %395 = vmatpush1.bf16.msra.mxu1 %v759_v17  ;;  %v762_v22 = vld [vmem:[#allocation8 + $0x10] ss:$8 sps:$4 sm:$0xff]   ;;  %v765_v25 = vld [vmem:[#allocation8 + $0x20] ss:$8 sps:$4 sm:$0xff]   ;;  %v91_v27 = vpack.c.bf16 %v80_v23, %v79_v21  ;;  %v766_v28 = vld [vmem:[#allocation8 + $0x34] ss:$8 sps:$4 sm:$0xff]  }
  0x43   :  { %396 = vmatprep.subr.bf16.mxu1 %v760_v20  ;;  %v81_v29 = vld [vmem:[#allocation3 + $0x50] sm:$0xff]  ;;  %v82_v30 = vld [vmem:[#allocation3 + $0x58] sm:$0xff]  ;;  %v768_v31 = vld [vmem:[#allocation8 + $0x30] ss:$8 sps:$4 sm:$0xff]  }
  0x44   :  { %v83_v32 = vld [vmem:[#allocation3 + $0x60] sm:$0xff]  ;;  %v84_v33 = vld [vmem:[#allocation3 + $0x68] sm:$0xff]  ;;  %v769_v34 = vld [vmem:[#allocation8 + $0x44] ss:$8 sps:$4 sm:$0xff]   ;;  %v92_v35 = vpack.c.bf16 %v82_v30, %v81_v29 }
  0x45   :  { %728 = vmatmul.mubr.msk.bf16.vlgmr.msra.gmra.mrb[0].mxu0 %vm117_vm2, %v88_v14  ;;  %v93_v36 = vpack.c.bf16 %v84_v33, %v83_v32  ;;  %v771_v37 = vld [vmem:[#allocation8 + $0x40] ss:$8 sps:$4 sm:$0xff]   ;;  %v772_v41 = vld [vmem:[#allocation8 + $0x54] ss:$8 sps:$4 sm:$0xff]   ;;  %v774_v42 = vld [vmem:[#allocation8 + $0x50] ss:$8 sps:$4 sm:$0xff]  }
  0x46   :  { %731 = vmatprep.mubr.msk.bf16.mxu0 %vm117_vm2, %v89_v15  ;;  %397 = vmatpush1.bf16.msra.mxu1 %v762_v22  ;;  %v85_v38 = vld [vmem:[#allocation3 + $0x70] sm:$0xff]  ;;  %v86_v39 = vld [vmem:[#allocation3 + $0x78] sm:$0xff]  ;;  %v778_v45 = vld [vmem:[#allocation8 + $0x74] ss:$8 sps:$4 sm:$0xff]  }
  0x47   :  { %398 = vmatprep.subr.bf16.mxu1 %v763_v24  ;;  %v94_v40 = vpack.c.bf16 %v86_v39, %v85_v38  ;;  %v775_v43 = vld [vmem:[#allocation8 + $0x64] ss:$8 sps:$4 sm:$0xff]   ;;  %v777_v44 = vld [vmem:[#allocation8 + $0x60] ss:$8 sps:$4 sm:$0xff]   ;;  %v780_v46 = vld [vmem:[#allocation8 + $0x70] ss:$8 sps:$4 sm:$0xff]  }
  0x48   :  { %v982_v48 = vld [vmem:[%s1084_s2] ss:$0 sm:$0xff] }
  0x4a   :  { %399 = vmatpush1.bf16.msra.mxu1 %v765_v25 }
  0x4b   :  { %400 = vmatprep.subr.bf16.mxu1 %v766_v28 }
  0x4d   :  { %732 = vmatmul.mubr.msk.bf16.gmra.mrb[4].mxu0 %vm117_vm2, %v90_v26 }
  0x4e   :  { %735 = vmatprep.mubr.msk.bf16.mxu0 %vm117_vm2, %v91_v27  ;;  %401 = vmatpush1.bf16.msra.mxu1 %v768_v31 }
  0x4f   :  { %402 = vmatprep.subr.bf16.mxu1 %v769_v34 }
  0x52   :  { %403 = vmatpush1.bf16.msra.mxu1 %v771_v37 }
  0x53   :  { %404 = vmatprep.subr.bf16.mxu1 %v772_v41 }
  0x55   :  { %736 = vmatmul.mubr.msk.bf16.gmra.mrb[8].mxu0 %vm117_vm2, %v92_v35 }
  0x56   :  { %739 = vmatprep.mubr.msk.bf16.mxu0 %vm117_vm2, %v93_v36  ;;  %405 = vmatpush1.bf16.msra.mxu1 %v774_v42 }
  0x57   :  { %406 = vmatprep.subr.bf16.mxu1 %v775_v43 }
  0x5a   :  { %407 = vmatpush1.bf16.msra.mxu1 %v777_v44 }
  0x5b   :  { %408 = vmatprep.subr.bf16.mxu1 %v778_v45 }
  0x5d   :  { %740 = vmatmul.mubr.msk.bf16.gmra.mrb[12].mxu0 %vm117_vm2, %v94_v40 }
  0x5e   :  { %409 = vmatpush1.bf16.msra.mxu1 %v780_v46 }
 0x118   :  { %v729_v49 = vpop.f32.mrb[0].mxu0 }
 0x119   :  { %v192_v50 = vadd.f32 %v729_v49, %v982_v48  ;;  %v183_v51 = vpop.f32.mrb[1].mxu0 }
 0x11a   :  { %v184_v52 = vadd.f32 %v982_v48, %v183_v51  ;;  %v730_v53 = vpop.f32.mrb[2].mxu0 }
 0x11b   :  { %v248_v54 = vmul.f32 0.2, %v192_v50  ;;  %v195_v55 = vadd.f32 %v730_v53, %v982_v48  ;;  %v186_v56 = vpop.f32.mrb[3].mxu0 }
 0x11c   :  { %v246_v57 = vmul.f32 0.2, %v184_v52  ;;  %v187_v58 = vadd.f32 %v982_v48, %v186_v56 }
 0x11d   :  { %v249_v59 = vmul.f32 0.2, %v195_v55  ;;  %v264_v61 = vmax.f32 %v192_v50, %v248_v54 }
 0x11e   :  { %v247_v60 = vmul.f32 0.2, %v187_v58  ;;  %v262_v63 = vmax.f32 %v184_v52, %v246_v57 }
 0x11f   :  { %v265_v62 = vmax.f32 %v195_v55, %v249_v59  ;;  %v888_v59 = vmov 1966171168  }
 0x120   :  { %v263_v0 = vmax.f32 %v187_v58, %v247_v60  ;;  %v733_v1 = vpop.f32.mrb[4].mxu0  ;;  %v608_v60 = vunpack.c.l.s4 %v888_v59 }
 0x121   :  { %v208_v2 = vadd.f32 %v733_v1, %v982_v48  ;;  %v199_v3 = vpop.f32.mrb[5].mxu0  ;;  %v279_v4 = vpack.c.bf16 %v265_v62, %v264_v61  ;;  %v1012_v62 = vld.sshfl [vmem:[%s1087_s5] sm:$0x11 pattern:$0x75316420] }
 0x122   :  { %v200_v5 = vadd.f32 %v982_v48, %v199_v3  ;;  %v278_v6 = vpack.c.bf16 %v263_v0, %v262_v63  ;;  %v734_v7 = vpop.f32.mrb[6].mxu0  ;;  %v609_v63 = vunpack.c.0.s8 %v608_v60  ;;  %v606_v0 = vcombine.high %v1012_v62, %v1012_v62  ;;  %v588_v3 = vld [vmem:[#allocation2] sm:$0x1] }
 0x123   :  { %v252_v8 = vmul.f32 0.2, %v208_v2  ;;  %v211_v9 = vadd.f32 %v734_v7, %v982_v48  ;;  %v202_v10 = vpop.f32.mrb[7].mxu0  ;;  %591 = vperm.xlu0 %754, %v588_v3  }
 0x124   :  { %v250_v11 = vmul.f32 0.2, %v200_v5  ;;  %427 = vmatmul.mubr.bf16.vlgmr.msra.gmra.mrb[0].mxu1 %v278_v6  ;;  %v203_v12 = vadd.f32 %v982_v48, %v202_v10 }
 0x125   :  { %v268_v13 = vmax.f32 %v208_v2, %v252_v8  ;;  %v253_v14 = vmul.f32 0.2, %v211_v9  ;;  %436 = vmatprep.mubr.bf16.mxu1 %v887_v47 }
 0x126   :  { %v266_v15 = vmax.f32 %v200_v5, %v250_v11  ;;  %v251_v16 = vmul.f32 0.2, %v203_v12  ;;  %v302_v5 = vld [vmem:[%s1086_s4] sm:$0x3]  ;;  %s889_s4 = smov [#allocation9]  }
 0x127   :  { %v269_v17 = vmax.f32 %v211_v9, %v253_v14  ;;  %s675_s20 = sshll.u32 %s889_s4, 4  ;;  %s676_s20 = int_to_ptr.vmem [resolvable:$true] %s675_s20 }
 0x128   :  { %v267_v18 = vmax.f32 %v203_v12, %v251_v16  ;;  %v737_v19 = vpop.f32.mrb[8].mxu0  ;;  %s851_s21 = scalar_lea.vmem %s676_s20, 16  ;;  %s855_s22 = scalar_lea.vmem %s676_s20, 32 }
 0x129   :  { %v224_v20 = vadd.f32 %v737_v19, %v982_v48  ;;  %v215_v21 = vpop.f32.mrb[9].mxu0  ;;  %v281_v22 = vpack.c.bf16 %v269_v17, %v268_v13  ;;  %p852_p10 = scmp.ne.s32.totalorder %s676_s20, %s851_s21  ;;  %p856_p11 = scmp.lt.s32.totalorder %s676_s20, %s676_s20 }
 0x12a   :  { %v216_v23 = vadd.f32 %v982_v48, %v215_v21  ;;  %v280_v24 = vpack.c.bf16 %v267_v18, %v266_v15  ;;  %v738_v25 = vpop.f32.mrb[10].mxu0  ;;  %p857_p12 = scmp.lt.s32.totalorder %s855_s22, %s851_s21 }
 0x12b   :  { %v256_v26 = vmul.f32 0.2, %v224_v20  ;;  %v227_v27 = vadd.f32 %v738_v25, %v982_v48  ;;  %v218_v28 = vpop.f32.mrb[11].mxu0 }
 0x12c   :  { %437 = vmatmul.mubr.bf16.gmra.mrb[4].mxu1 %v279_v4  ;;  %v254_v29 = vmul.f32 0.2, %v216_v23  ;;  %v219_v30 = vadd.f32 %v982_v48, %v218_v28  ;;  %p858_p13 = por %p857_p12, %p856_p11 }
 0x12d   :  { %v272_v31 = vmax.f32 %v224_v20, %v256_v26  ;;  %446 = vmatprep.mubr.bf16.mxu1 %v887_v47  ;;  %v257_v32 = vmul.f32 0.2, %v227_v27 }
 0x12e   :  { %v270_v33 = vmax.f32 %v216_v23, %v254_v29  ;;  %v255_v34 = vmul.f32 0.2, %v219_v30  ;;  %p859_p0 = pnand %p858_p13, %p852_p10 }
 0x12f   :  { %v273_v35 = vmax.f32 %v227_v27, %v257_v32 }
 0x130   :  { %v271_v36 = vmax.f32 %v219_v30, %v255_v34  ;;  %v741_v37 = vpop.f32.mrb[12].mxu0 }
 0x131   :  { %v240_v38 = vadd.f32 %v741_v37, %v982_v48  ;;  %v231_v39 = vpop.f32.mrb[13].mxu0  ;;  %v283_v40 = vpack.c.bf16 %v273_v35, %v272_v31 }
 0x132   :  { %v232_v41 = vadd.f32 %v982_v48, %v231_v39  ;;  %v282_v42 = vpack.c.bf16 %v271_v36, %v270_v33  ;;  %v742_v43 = vpop.f32.mrb[14].mxu0 }
 0x133   :  { %v260_v44 = vmul.f32 0.2, %v240_v38  ;;  %v243_v45 = vadd.f32 %v742_v43, %v982_v48  ;;  %v234_v46 = vpop.f32.mrb[15].mxu0 }
 0x134   :  { %447 = vmatmul.mubr.bf16.gmra.mrb[8].mxu1 %v280_v24  ;;  %v258_v49 = vmul.f32 0.2, %v232_v41  ;;  %v235_v50 = vadd.f32 %v982_v48, %v234_v46  ;;  %v304_v48 = vlaneseq }
 0x135   :  { %456 = vmatprep.mubr.bf16.mxu1 %v887_v47  ;;  %v276_v51 = vmax.f32 %v240_v38, %v260_v44  ;;  %v261_v52 = vmul.f32 0.2, %v243_v45 }
 0x136   :  { %v274_v53 = vmax.f32 %v232_v41, %v258_v49  ;;  %v259_v54 = vmul.f32 0.2, %v235_v50  ;;  %v1007_v61 = vshrl.u32 %v304_v48, 7 }
 0x137   :  { %v277_v55 = vmax.f32 %v243_v45, %v261_v52 }
 0x138   :  { %v275_v56 = vmax.f32 %v235_v50, %v259_v54  ;;  %v1017_v1 = vsub.s32 %v609_v63, %v1007_v61  ;;  %v306_v4 = vsub.s32 0, %v1007_v61  ;;  %v310_v6 = vsub.s32 1, %v1007_v61 }
 0x139   :  { %v285_v57 = vpack.c.bf16 %v277_v55, %v276_v51 }
 0x13a   :  { %v284_v58 = vpack.c.bf16 %v275_v56, %v274_v53  ;;  %v620_v2 = vrot.slane %v606_v0, %v1017_v1  ;;  %v1029_v7 = vrot.slane %v302_v5, %v306_v4  ;;  %v1031_v8 = vrot.slane %v302_v5, %v310_v6 }
 0x13c   :  { %457 = vmatmul.mubr.bf16.gmra.mrb[12].mxu1 %v281_v22  ;;  %655 = vmatprep.mubr.bf16.mxu0 %v620_v2 }
 0x13d   :  { %466 = vmatprep.mubr.bf16.mxu1 %v887_v47 }
 0x144   :  { %467 = vmatmul.mubr.bf16.gmra.mrb[16].mxu1 %v282_v42 }
 0x145   :  { %476 = vmatprep.mubr.bf16.mxu1 %v887_v47 }
 0x14c   :  { %477 = vmatmul.mubr.bf16.gmra.mrb[20].mxu1 %v283_v40 }
 0x14d   :  { %486 = vmatprep.mubr.bf16.mxu1 %v887_v47 }
 0x154   :  { %487 = vmatmul.mubr.bf16.gmra.mrb[24].mxu1 %v284_v58 }
 0x155   :  { %496 = vmatprep.mubr.bf16.mxu1 %v887_v47  ;;  %v613_v47 = vrot.slane %v1012_v62, %v1017_v1 }
 0x15c   :  { %497 = vmatmul.mubr.bf16.gmra.mrb[28].mxu1 %v285_v57 }
 0x1f7   :  { %v428_v9 = vpop.f32.mrb[0].mxu1 }
 0x1f8   :  { %v429_v10 = vadd.f32 %v428_v9, %v1029_v7  ;;  %v430_v11 = vpop.f32.mrb[1].mxu1 }
 0x1f9   :  { %v431_v12 = vadd.f32 %v430_v11, %v1031_v8  ;;  %v432_v13 = vpop.f32.mrb[2].mxu1 }
 0x1fa   :  { %v507_v14 = vmul.f32 0.2, %v429_v10  ;;  %v433_v15 = vadd.f32 %v432_v13, %v1029_v7  ;;  %v434_v16 = vpop.f32.mrb[3].mxu1 }
 0x1fb   :  { %v508_v17 = vmul.f32 0.2, %v431_v12  ;;  %v435_v18 = vadd.f32 %v434_v16, %v1031_v8 }
 0x1fc   :  { %v509_v19 = vmul.f32 0.2, %v433_v15  ;;  %v539_v21 = vmax.f32 %v429_v10, %v507_v14 }
 0x1fd   :  { %v510_v20 = vmul.f32 0.2, %v435_v18  ;;  %v540_v23 = vmax.f32 %v431_v12, %v508_v17 }
 0x1fe   :  { %v541_v22 = vmax.f32 %v433_v15, %v509_v19 }
 0x1ff   :  { %v542_v24 = vmax.f32 %v435_v18, %v510_v20  ;;  %v438_v25 = vpop.f32.mrb[4].mxu1 }
 0x200   :  { %v572_v26 = vpack.c.bf16 %v541_v22, %v539_v21  ;;  %v439_v27 = vadd.f32 %v438_v25, %v1029_v7  ;;  %v440_v28 = vpop.f32.mrb[5].mxu1 }
 0x201   :  { %v441_v29 = vadd.f32 %v440_v28, %v1031_v8  ;;  %v442_v30 = vpop.f32.mrb[6].mxu1  ;;  %v573_v31 = vpack.c.bf16 %v542_v24, %v540_v23 }
 0x202   :  { %v511_v32 = vmul.f32 0.2, %v439_v27  ;;  %v443_v33 = vadd.f32 %v442_v30, %v1029_v7  ;;  %v444_v34 = vpop.f32.mrb[7].mxu1 }
 0x203   :  { %v512_v35 = vmul.f32 0.2, %v441_v29  ;;  %v445_v36 = vadd.f32 %v444_v34, %v1031_v8  ;;  %623 = vmatprep.subr.bf16.mxu0 %v573_v31 }
 0x204   :  { %v513_v37 = vmul.f32 0.2, %v443_v33  ;;  %624 = vmatpush1.bf16.xpose.msra.mxu0 %v572_v26  ;;  %v543_v39 = vmax.f32 %v439_v27, %v511_v32 }
 0x205   :  { %v514_v38 = vmul.f32 0.2, %v445_v36  ;;  %v544_v41 = vmax.f32 %v441_v29, %v512_v35 }
 0x206   :  { %v545_v40 = vmax.f32 %v443_v33, %v513_v37 }
 0x207   :  { %v546_v42 = vmax.f32 %v445_v36, %v514_v38  ;;  %v448_v43 = vpop.f32.mrb[8].mxu1 }
 0x208   :  { %v574_v44 = vpack.c.bf16 %v545_v40, %v543_v39  ;;  %v449_v45 = vadd.f32 %v448_v43, %v1029_v7  ;;  %v450_v46 = vpop.f32.mrb[9].mxu1 }
 0x209   :  { %v451_v49 = vadd.f32 %v450_v46, %v1031_v8  ;;  %v452_v50 = vpop.f32.mrb[10].mxu1  ;;  %v575_v51 = vpack.c.bf16 %v546_v42, %v544_v41 }
 0x20a   :  { %v515_v52 = vmul.f32 0.2, %v449_v45  ;;  %v453_v53 = vadd.f32 %v452_v50, %v1029_v7  ;;  %v454_v54 = vpop.f32.mrb[11].mxu1 }
 0x20b   :  { %v516_v55 = vmul.f32 0.2, %v451_v49  ;;  %v455_v56 = vadd.f32 %v454_v54, %v1031_v8  ;;  %625 = vmatprep.subr.bf16.mxu0 %v575_v51 }
 0x20c   :  { %v517_v57 = vmul.f32 0.2, %v453_v53  ;;  %626 = vmatpush1.bf16.xpose.msra.mxu0 %v574_v44  ;;  %v547_v48 = vmax.f32 %v449_v45, %v515_v52 }
 0x20d   :  { %v518_v58 = vmul.f32 0.2, %v455_v56  ;;  %v548_v60 = vmax.f32 %v451_v49, %v516_v55 }
 0x20e   :  { %v549_v59 = vmax.f32 %v453_v53, %v517_v57 }
 0x20f   :  { %v550_v63 = vmax.f32 %v455_v56, %v518_v58  ;;  %v458_v0 = vpop.f32.mrb[12].mxu1 }
 0x210   :  { %v576_v2 = vpack.c.bf16 %v549_v59, %v547_v48  ;;  %v459_v3 = vadd.f32 %v458_v0, %v1029_v7  ;;  %v460_v5 = vpop.f32.mrb[13].mxu1 }
 0x211   :  { %v461_v6 = vadd.f32 %v460_v5, %v1031_v8  ;;  %v462_v9 = vpop.f32.mrb[14].mxu1  ;;  %v577_v10 = vpack.c.bf16 %v550_v63, %v548_v60 }
 0x212   :  { %v519_v11 = vmul.f32 0.2, %v459_v3  ;;  %v463_v12 = vadd.f32 %v462_v9, %v1029_v7  ;;  %v464_v13 = vpop.f32.mrb[15].mxu1 }
 0x213   :  { %v520_v14 = vmul.f32 0.2, %v461_v6  ;;  %v465_v15 = vadd.f32 %v464_v13, %v1031_v8  ;;  %627 = vmatprep.subr.bf16.mxu0 %v577_v10 }
 0x214   :  { %v521_v16 = vmul.f32 0.2, %v463_v12  ;;  %628 = vmatpush1.bf16.xpose.msra.mxu0 %v576_v2  ;;  %v551_v18 = vmax.f32 %v459_v3, %v519_v11 }
 0x215   :  { %v522_v17 = vmul.f32 0.2, %v465_v15  ;;  %v552_v20 = vmax.f32 %v461_v6, %v520_v14 }
 0x216   :  { %v553_v19 = vmax.f32 %v463_v12, %v521_v16 }
 0x217   :  { %v554_v21 = vmax.f32 %v465_v15, %v522_v17  ;;  %v468_v22 = vpop.f32.mrb[16].mxu1 }
 0x218   :  { %v578_v23 = vpack.c.bf16 %v553_v19, %v551_v18  ;;  %v469_v24 = vadd.f32 %v468_v22, %v1029_v7  ;;  %v470_v25 = vpop.f32.mrb[17].mxu1 }
 0x219   :  { %v471_v26 = vadd.f32 %v470_v25, %v1031_v8  ;;  %v472_v27 = vpop.f32.mrb[18].mxu1  ;;  %v579_v28 = vpack.c.bf16 %v554_v21, %v552_v20 }
 0x21a   :  { %v523_v29 = vmul.f32 0.2, %v469_v24  ;;  %v473_v30 = vadd.f32 %v472_v27, %v1029_v7  ;;  %v474_v31 = vpop.f32.mrb[19].mxu1 }
 0x21b   :  { %v524_v32 = vmul.f32 0.2, %v471_v26  ;;  %v475_v33 = vadd.f32 %v474_v31, %v1031_v8  ;;  %629 = vmatprep.subr.bf16.mxu0 %v579_v28 }
 0x21c   :  { %v525_v34 = vmul.f32 0.2, %v473_v30  ;;  %630 = vmatpush1.bf16.xpose.msra.mxu0 %v578_v23  ;;  %v555_v36 = vmax.f32 %v469_v24, %v523_v29 }
 0x21d   :  { %v526_v35 = vmul.f32 0.2, %v475_v33  ;;  %v556_v38 = vmax.f32 %v471_v26, %v524_v32 }
 0x21e   :  { %v557_v37 = vmax.f32 %v473_v30, %v525_v34 }
 0x21f   :  { %v558_v39 = vmax.f32 %v475_v33, %v526_v35  ;;  %v478_v40 = vpop.f32.mrb[20].mxu1 }
 0x220   :  { %v580_v41 = vpack.c.bf16 %v557_v37, %v555_v36  ;;  %v479_v42 = vadd.f32 %v478_v40, %v1029_v7  ;;  %v480_v43 = vpop.f32.mrb[21].mxu1 }
 0x221   :  { %v481_v44 = vadd.f32 %v480_v43, %v1031_v8  ;;  %v482_v45 = vpop.f32.mrb[22].mxu1  ;;  %v581_v46 = vpack.c.bf16 %v558_v39, %v556_v38 }
 0x222   :  { %v527_v49 = vmul.f32 0.2, %v479_v42  ;;  %v483_v50 = vadd.f32 %v482_v45, %v1029_v7  ;;  %v484_v51 = vpop.f32.mrb[23].mxu1 }
 0x223   :  { %v528_v52 = vmul.f32 0.2, %v481_v44  ;;  %v485_v53 = vadd.f32 %v484_v51, %v1031_v8  ;;  %631 = vmatprep.subr.bf16.mxu0 %v581_v46 }
 0x224   :  { %v529_v54 = vmul.f32 0.2, %v483_v50  ;;  %632 = vmatpush1.bf16.xpose.msra.mxu0 %v580_v41  ;;  %v559_v56 = vmax.f32 %v479_v42, %v527_v49 }
 0x225   :  { %v530_v55 = vmul.f32 0.2, %v485_v53  ;;  %v560_v58 = vmax.f32 %v481_v44, %v528_v52 }
 0x226   :  { %v561_v57 = vmax.f32 %v483_v50, %v529_v54 }
 0x227   :  { %v562_v48 = vmax.f32 %v485_v53, %v530_v55  ;;  %v488_v59 = vpop.f32.mrb[24].mxu1 }
 0x228   :  { %v582_v60 = vpack.c.bf16 %v561_v57, %v559_v56  ;;  %v489_v63 = vadd.f32 %v488_v59, %v1029_v7  ;;  %v490_v0 = vpop.f32.mrb[25].mxu1 }
 0x229   :  { %v491_v2 = vadd.f32 %v490_v0, %v1031_v8  ;;  %v492_v3 = vpop.f32.mrb[26].mxu1  ;;  %v583_v5 = vpack.c.bf16 %v562_v48, %v560_v58 }
 0x22a   :  { %v531_v6 = vmul.f32 0.2, %v489_v63  ;;  %v493_v9 = vadd.f32 %v492_v3, %v1029_v7  ;;  %v494_v10 = vpop.f32.mrb[27].mxu1 }
 0x22b   :  { %v532_v11 = vmul.f32 0.2, %v491_v2  ;;  %v495_v12 = vadd.f32 %v494_v10, %v1031_v8  ;;  %633 = vmatprep.subr.bf16.mxu0 %v583_v5 }
 0x22c   :  { %v533_v13 = vmul.f32 0.2, %v493_v9  ;;  %634 = vmatpush1.bf16.xpose.msra.mxu0 %v582_v60  ;;  %v563_v15 = vmax.f32 %v489_v63, %v531_v6 }
 0x22d   :  { %v534_v14 = vmul.f32 0.2, %v495_v12  ;;  %v564_v17 = vmax.f32 %v491_v2, %v532_v11 }
 0x22e   :  { %v565_v16 = vmax.f32 %v493_v9, %v533_v13 }
 0x22f   :  { %v566_v18 = vmax.f32 %v495_v12, %v534_v14  ;;  %v498_v19 = vpop.f32.mrb[28].mxu1 }
 0x230   :  { %v584_v20 = vpack.c.bf16 %v565_v16, %v563_v15  ;;  %v499_v21 = vadd.f32 %v498_v19, %v1029_v7  ;;  %v500_v22 = vpop.f32.mrb[29].mxu1 }
 0x231   :  { %v501_v23 = vadd.f32 %v500_v22, %v1031_v8  ;;  %v502_v24 = vpop.f32.mrb[30].mxu1  ;;  %v585_v25 = vpack.c.bf16 %v566_v18, %v564_v17 }
 0x232   :  { %v535_v26 = vmul.f32 0.2, %v499_v21  ;;  %v503_v27 = vadd.f32 %v502_v24, %v1029_v7  ;;  %v504_v28 = vpop.f32.mrb[31].mxu1  ;;  %v592_v7 = vpop.permute.xlu0 %591 }
 0x233   :  { %v536_v29 = vmul.f32 0.2, %v501_v23  ;;  %v505_v30 = vadd.f32 %v504_v28, %v1031_v8  ;;  %635 = vmatprep.subr.bf16.mxu0 %v585_v25  ;;  %v597_v8 = vrot.slane %v592_v7, %v306_v4 }
 0x234   :  { %v537_v31 = vmul.f32 0.2, %v503_v27  ;;  %636 = vmatpush1.bf16.xpose.msra.mxu0 %v584_v20  ;;  %v567_v33 = vmax.f32 %v499_v21, %v535_v26 }
 0x235   :  { %v538_v32 = vmul.f32 0.2, %v505_v30  ;;  %v568_v35 = vmax.f32 %v501_v23, %v536_v29 }
 0x236   :  { %v569_v34 = vmax.f32 %v503_v27, %v537_v31 }
 0x237   :  { %v570_v36 = vmax.f32 %v505_v30, %v538_v32 }
 0x238   :  { %v586_v37 = vpack.c.bf16 %v569_v34, %v567_v33 }
 0x239   :  { %v587_v38 = vpack.c.bf16 %v570_v36, %v568_v35 }
 0x23b   :  { %637 = vmatprep.subr.bf16.mxu0 %v587_v38 }
 0x23c   :  { %638 = vmatpush1.bf16.xpose.msra.mxu0 %v586_v37 }
 0x243   :  { %656 = vmatmul.mubr.bf16.vlgmr.msra.gmra.mrb[16].mxu0 %v613_v47 }
 0x316   :  { %v657_v39 = vpop.f32.mrb[16].mxu0 }
 0x317   :  { %v658_v40 = vadd.f32 %v657_v39, %v597_v8  ;;  %v659_v41 = vpop.f32.mrb[17].mxu0 }
 0x318   :  { %v660_v42 = vpop.f32.mrb[18].mxu0 }
 0x319   :  { %v663_v43 = vsub.f32 0.0, %v658_v40  ;;  %v661_v44 = vpop.f32.mrb[19].mxu0 }
 0x31b   :  { %v664_v45 = vmul.f32 1.442695, %v663_v43 }
 0x31d   :  { %781 = vpow2.f32 %v664_v45 }
 0x327   :  { %v782_v46 = vpop.eup %781 }
 0x328   :  { %v666_v49 = vadd.f32 1.0, %v782_v46 }
 0x32a   :  { %783 = vrcp.f32 %v666_v49 }
 0x334   :  { %v784_v62 = vpop.eup %783 }
 0x335   :  { %668 = vst [vmem:[#allocation9] sm:$0x1] %v784_v62 }
 0x336   :  { %862 = shalt.err (!%p859_p0)
}
 0x337   :  { %s863_s25 = scalar_lea.hbm %s1089_s7, 16 }
 0x338   :  { %p864_p1 = scmp.ne.s32.totalorder %s1089_s7, %s863_s25  ;;  %p867_p2 = scmp.lt.u32.totalorder %s863_s25, %s1089_s7 }
 0x33a   :  { %p869_p3 = pnand %p867_p2, %p864_p1 }
 0x33c   :  { %872 = shalt.err (!%p869_p3)
}
 0x33d   :  { %678 = dma.vmem_to_hbm [thread:$0]  %s676_s20, 16, %s1089_s7, [#allocation5]  }
 0x33e   :  { %877 = dma.done.wait [#allocation5], 16  }
 0x33f   :  { %878 = vsyncadd [#allocation5], 4294967280 }
 0x340   :  { %682 = vsyncpa [#allocation4], 1 }
 0x341   :  { %683 = vsyncpa [#allocation7], 1 }
 0x342   :  { %684 = vsyncpa [#allocation5], 1 }

</bundles_post_ra>
